<compile_context>
chip_gen: v6e
topology: v6e:2x2x1
jax: 0.10.0
libtpu: 0.0.40
codegen_flags: <defaults>
</compile_context>

<pallas_src>
import numpy as np
import jax
import jax.numpy as jnp
from jax import lax
from jax.experimental import pallas as pl
from jax.experimental.pallas import tpu as pltpu


def _taps_and_masks(H, W, K):
    """Static per-tap lane shifts and 0/1 validity masks implementing 'same' padding."""
    P = K // 2
    HW = H * W
    y = np.arange(HW) // W
    x = np.arange(HW) % W
    shifts, masks = [], []
    for dy in range(K):
        for dx in range(K):
            oy, ox = dy - P, dx - P
            s = oy * W + ox                      # flattened source offset
            shifts.append((-s) % HW)             # pltpu.roll shift (np.roll semantics)
            ok = ((y + oy >= 0) & (y + oy < H) &
                  (x + ox >= 0) & (x + ox < W))
            masks.append(ok.astype(np.float32))
    return tuple(shifts), np.stack(masks, axis=0)          # (K*K, HW)


def _prep_weights(wfx, wfh, wox, woh, mxu_dtype):
    """HWIO (K,K,C,C) conv weights -> fused im2col matrices.

    w1: (2C, K*K*2C) computes [f_logits ; ox_logits] from the stacked [x; h] slab.
    w2: (C,  K*K*2C) computes conv_oh        from the stacked [f*h; 0] slab.
    Column index = tap*(2C) + j, with j in [0, 2C) = [x-channels, h-channels].
    """
    K, _, C, _ = wfx.shape
    wx = jnp.concatenate([wfx, wox], axis=3)                     # (K,K,C,2C)
    wh = jnp.concatenate([wfh, jnp.zeros_like(wfh)], axis=3)     # (K,K,C,2C)
    wxh = jnp.concatenate([wx, wh], axis=2)                      # (K,K,2C,2C)
    w1 = wxh.reshape(K * K * 2 * C, 2 * C).T                     # (2C, K*K*2C)
    woh_p = jnp.concatenate([woh, jnp.zeros_like(woh)], axis=2)  # (K,K,2C,C)
    w2 = woh_p.reshape(K * K * 2 * C, C).T                       # (C, K*K*2C)
    return w1.astype(mxu_dtype), w2.astype(mxu_dtype)


def _make_kernel(C, shifts, mxu_dtype):
    def kernel(xh_ref, valid_ref, w1_ref, w2_ref, bf_ref, bo_ref, out_ref):
        xh = xh_ref[0]                      # (2C, HW) f32; rows [0:C]=x, [C:2C]=h
        h = xh[C:, :]                       # (C, HW)

        def make_col(a):                    # (2C, HW) -> (K*K*2C, HW) im2col slab
            chunks = []
            for t, s in enumerate(shifts):
                rolled = a if s == 0 else pltpu.roll(a, s, axis=1)
                chunks.append(rolled * valid_ref[t:t + 1, :])   # zero the boundary taps
            return jnp.concatenate(chunks, axis=0)

        # Fused gate logits: rows [0:C] -> forget gate (wfx*x + wfh*h),
        #                    rows [C:2C] -> out-gate x-path (wox*x).
        xh_col = make_col(xh).astype(mxu_dtype)
        logits = jnp.dot(w1_ref[...], xh_col,
                         preferred_element_type=jnp.float32)    # (2C, HW) f32

        f = jax.nn.sigmoid(logits[:C, :] + bf_ref[...])         # (C, HW)
        ox_logits = logits[C:, :]                               # (C, HW)

        fh = f * h                                              # (C, HW)
        fh_pad = jnp.concatenate([fh, jnp.zeros_like(fh)], axis=0)   # (2C, HW)
        fh_col = make_col(fh_pad).astype(mxu_dtype)
        oh = jnp.dot(w2_ref[...], fh_col,
                     preferred_element_type=jnp.float32)        # (C, HW)

        changes = jnp.tanh(ox_logits + oh + bo_ref[...])
        new_h = fh + (1.0 - f) * changes
        out_ref[0] = new_h.astype(out_ref.dtype)                # lane-dense store

    return kernel


def conv_min_gru(x_nchw, params, last_hidden_state=None, mxu_dtype=jnp.float32):
    """Pallas ConvMinGRU forward. x_nchw: (N, C, H, W) f32; returns (N, C, H, W)."""
    wfx, bfx, wfh, bfh, wox, box, woh, boh = params
    if last_hidden_state is None:
        last_hidden_state = jnp.zeros_like(x_nchw)

    N, C, H, W = x_nchw.shape
    K = wfx.shape[0]
    HW = H * W
    C2 = 2 * C

    # NCHW -> (N, C, H*W) is a free reshape (no transpose / pad HBM round trips).
    x = x_nchw.reshape(N, C, HW).astype(jnp.float32)
    h = last_hidden_state.reshape(N, C, HW).astype(jnp.float32)
    xh = jnp.concatenate([x, h], axis=1)                         # (N, 2C, HW)

    shifts, masks = _taps_and_masks(H, W, K)
    valid = jnp.asarray(masks)                                   # (K*K, HW) of {0,1}
    w1, w2 = _prep_weights(wfx, wfh, wox, woh, mxu_dtype)
    # The two biases of each gate always appear summed in the forward pass.
    b_f = (bfx + bfh).reshape(C, 1).astype(jnp.float32)
    b_o = (box + boh).reshape(C, 1).astype(jnp.float32)

    kernel = _make_kernel(C, shifts, mxu_dtype)

    def full(a):
        return pl.BlockSpec(a.shape, lambda b: (0,) * a.ndim)

    out = pl.pallas_call(
        kernel,
        out_shape=jax.ShapeDtypeStruct((N, C, HW), jnp.float32),
        grid=(N,),
        in_specs=[pl.BlockSpec((1, C2, HW), lambda b: (b, 0, 0)),
                  full(valid), full(w1), full(w2), full(b_f), full(b_o)],
        out_specs=pl.BlockSpec((1, C, HW), lambda b: (b, 0, 0)),
        compiler_params=pltpu.CompilerParams(
            dimension_semantics=("parallel",)),   # batch split across TCs on v7x
    )(xh, valid, w1, w2, b_f, b_o)

    return out.reshape(N, C, H, W)


def conv_min_gru_ref(x_nchw, params, last_hidden_state=None):
    """Pure-JAX reference (lax conv), same NCHW interface."""
    wfx, bfx, wfh, bfh, wox, box, woh, boh = params
    if last_hidden_state is None:
        last_hidden_state = jnp.zeros_like(x_nchw)
    x = jnp.transpose(x_nchw, (0, 2, 3, 1))
    h = jnp.transpose(last_hidden_state, (0, 2, 3, 1))

    def conv(inp, w, b):
        out = lax.conv_general_dilated(
            inp, w, window_strides=(1, 1), padding="SAME",
            dimension_numbers=("NHWC", "HWIO", "NHWC"))
        return out + b[None, None, None, :]

    f = jax.nn.sigmoid(conv(x, wfx, bfx) + conv(h, wfh, bfh))
    changes = jnp.tanh(conv(x, wox, box) + conv(f * h, woh, boh))
    new_h = f * h + (1.0 - f) * changes
    return jnp.transpose(new_h, (0, 3, 1, 2))


if __name__ == "__main__":
    # Small shapes: batch=2, channels=4, spatial=16x16, kernel_size=3.
    N, C, H, W, K = 2, 4, 16, 16, 3

    key = jax.random.PRNGKey(0)
    kx, kh, k1, k2, k3, k4 = jax.random.split(key, 6)

    # Deterministic synthetic parameters (HWIO weight layout; bias=1.0 as in
    # the PyTorch module's __init__).
    scale = 0.1
    wfx = scale * jax.random.normal(k1, (K, K, C, C), jnp.float32)
    wfh = scale * jax.random.normal(k2, (K, K, C, C), jnp.float32)
    wox = scale * jax.random.normal(k3, (K, K, C, C), jnp.float32)
    woh = scale * jax.random.normal(k4, (K, K, C, C), jnp.float32)
    bfx = jnp.ones((C,), jnp.float32)
    bfh = jnp.ones((C,), jnp.float32)
    box = jnp.ones((C,), jnp.float32)
    boh = jnp.ones((C,), jnp.float32)
    params = (wfx, bfx, wfh, bfh, wox, box, woh, boh)

    x = jax.random.normal(kx, (N, C, H, W), jnp.float32)    # NCHW like PyTorch
    h0 = jax.random.normal(kh, (N, C, H, W), jnp.float32)   # last_hidden_state

    ref = jax.block_until_ready(conv_min_gru_ref(x, params, h0))

    # f32 MXU path.
    out = jax.block_until_ready(conv_min_gru(x, params, h0))
    np.testing.assert_allclose(np.asarray(out), np.asarray(ref),
                               rtol=1e-4, atol=2e-5)

    # Default path (last_hidden_state=None -> zeros).
    out0 = jax.block_until_ready(conv_min_gru(x, params, None))
    ref0 = jax.block_until_ready(conv_min_gru_ref(x, params, None))
    np.testing.assert_allclose(np.asarray(out0), np.asarray(ref0),
                               rtol=1e-4, atol=2e-5)

    # bf16 MXU operands (v6e/v7x fast path); accumulation + elementwise stay f32.
    out_bf16 = jax.block_until_ready(
        conv_min_gru(x, params, h0, mxu_dtype=jnp.bfloat16))
    np.testing.assert_allclose(np.asarray(out_bf16), np.asarray(ref),
                               rtol=5e-2, atol=5e-2)

    print("KERNEL_OK")
</pallas_src>

<mosaic_0001>
module attributes {stable_mosaic.version = 11 : i64} {
  func.func @kernel(%arg0: i32, %arg1: memref<1x8x256xf32, #tpu.memory_space<vmem>>, %arg2: memref<9x256xf32, #tpu.memory_space<vmem>>, %arg3: memref<8x72xf32, #tpu.memory_space<vmem>>, %arg4: memref<4x72xf32, #tpu.memory_space<vmem>>, %arg5: memref<4x1xf32, #tpu.memory_space<vmem>>, %arg6: memref<4x1xf32, #tpu.memory_space<vmem>>, %arg7: memref<1x4x256xf32, #tpu.memory_space<vmem>>) attributes {dimension_semantics = [#tpu.dimension_semantics<parallel>], iteration_bounds = array<i64: 2>, scalar_prefetch = 0 : i64, scratch_operands = 0 : i64, tpu.core_type = #tpu.core_type<tc>, window_params = [{transform_indices = @transform_0, window_bounds = array<i64: 1, 8, 256>}, {pipeline_mode = #tpu.pipeline_mode<synchronous>, transform_indices = @transform_1, window_bounds = array<i64: 9, 256>}, {pipeline_mode = #tpu.pipeline_mode<synchronous>, transform_indices = @transform_2, window_bounds = array<i64: 8, 72>}, {pipeline_mode = #tpu.pipeline_mode<synchronous>, transform_indices = @transform_3, window_bounds = array<i64: 4, 72>}, {pipeline_mode = #tpu.pipeline_mode<synchronous>, transform_indices = @transform_4, window_bounds = array<i64: 4, 1>}, {pipeline_mode = #tpu.pipeline_mode<synchronous>, transform_indices = @transform_5, window_bounds = array<i64: 4, 1>}, {transform_indices = @transform_6, window_bounds = array<i64: 1, 4, 256>}]} {
    %c0 = arith.constant 0 : index
    %c0_0 = arith.constant 0 : index
    %c0_1 = arith.constant 0 : index
    %0 = vector.load %arg1[%c0, %c0_0, %c0_1] : memref<1x8x256xf32, #tpu.memory_space<vmem>>, vector<1x8x256xf32>
    %1 = vector.shape_cast %0 : vector<1x8x256xf32> to vector<8x256xf32>
    %2 = vector.extract_strided_slice %1 {offsets = [4, 0], sizes = [4, 256], strides = [1, 1]} : vector<8x256xf32> to vector<4x256xf32>
    %c17_i32 = arith.constant 17 : i32
    %3 = tpu.dynamic_rotate %1 by %c17_i32 dim 1 : vector<8x256xf32>, i32 -> vector<8x256xf32>
    %c0_2 = arith.constant 0 : index
    %c0_3 = arith.constant 0 : index
    %4 = vector.load %arg2[%c0_2, %c0_3] : memref<9x256xf32, #tpu.memory_space<vmem>>, vector<1x256xf32>
    %5 = vector.broadcast %4 : vector<1x256xf32> to vector<8x256xf32>
    %6 = arith.mulf %3, %5 : vector<8x256xf32>
    %c16_i32 = arith.constant 16 : i32
    %7 = tpu.dynamic_rotate %1 by %c16_i32 dim 1 : vector<8x256xf32>, i32 -> vector<8x256xf32>
    %c1 = arith.constant 1 : index
    %c0_4 = arith.constant 0 : index
    %8 = vector.load %arg2[%c1, %c0_4] : memref<9x256xf32, #tpu.memory_space<vmem>>, vector<1x256xf32>
    %9 = vector.broadcast %8 : vector<1x256xf32> to vector<8x256xf32>
    %10 = arith.mulf %7, %9 : vector<8x256xf32>
    %c15_i32 = arith.constant 15 : i32
    %11 = tpu.dynamic_rotate %1 by %c15_i32 dim 1 : vector<8x256xf32>, i32 -> vector<8x256xf32>
    %c2 = arith.constant 2 : index
    %c0_5 = arith.constant 0 : index
    %12 = vector.load %arg2[%c2, %c0_5] : memref<9x256xf32, #tpu.memory_space<vmem>>, vector<1x256xf32>
    %13 = vector.broadcast %12 : vector<1x256xf32> to vector<8x256xf32>
    %14 = arith.mulf %11, %13 : vector<8x256xf32>
    %c1_i32 = arith.constant 1 : i32
    %15 = tpu.dynamic_rotate %1 by %c1_i32 dim 1 : vector<8x256xf32>, i32 -> vector<8x256xf32>
    %c3 = arith.constant 3 : index
    %c0_6 = arith.constant 0 : index
    %16 = vector.load %arg2[%c3, %c0_6] : memref<9x256xf32, #tpu.memory_space<vmem>>, vector<1x256xf32>
    %17 = vector.broadcast %16 : vector<1x256xf32> to vector<8x256xf32>
    %18 = arith.mulf %15, %17 : vector<8x256xf32>
    %c4 = arith.constant 4 : index
    %c0_7 = arith.constant 0 : index
    %19 = vector.load %arg2[%c4, %c0_7] : memref<9x256xf32, #tpu.memory_space<vmem>>, vector<1x256xf32>
    %20 = vector.broadcast %19 : vector<1x256xf32> to vector<8x256xf32>
    %21 = arith.mulf %1, %20 : vector<8x256xf32>
    %c255_i32 = arith.constant 255 : i32
    %22 = tpu.dynamic_rotate %1 by %c255_i32 dim 1 : vector<8x256xf32>, i32 -> vector<8x256xf32>
    %c5 = arith.constant 5 : index
    %c0_8 = arith.constant 0 : index
    %23 = vector.load %arg2[%c5, %c0_8] : memref<9x256xf32, #tpu.memory_space<vmem>>, vector<1x256xf32>
    %24 = vector.broadcast %23 : vector<1x256xf32> to vector<8x256xf32>
    %25 = arith.mulf %22, %24 : vector<8x256xf32>
    %c241_i32 = arith.constant 241 : i32
    %26 = tpu.dynamic_rotate %1 by %c241_i32 dim 1 : vector<8x256xf32>, i32 -> vector<8x256xf32>
    %c6 = arith.constant 6 : index
    %c0_9 = arith.constant 0 : index
    %27 = vector.load %arg2[%c6, %c0_9] : memref<9x256xf32, #tpu.memory_space<vmem>>, vector<1x256xf32>
    %28 = vector.broadcast %27 : vector<1x256xf32> to vector<8x256xf32>
    %29 = arith.mulf %26, %28 : vector<8x256xf32>
    %c240_i32 = arith.constant 240 : i32
    %30 = tpu.dynamic_rotate %1 by %c240_i32 dim 1 : vector<8x256xf32>, i32 -> vector<8x256xf32>
    %c7 = arith.constant 7 : index
    %c0_10 = arith.constant 0 : index
    %31 = vector.load %arg2[%c7, %c0_10] : memref<9x256xf32, #tpu.memory_space<vmem>>, vector<1x256xf32>
    %32 = vector.broadcast %31 : vector<1x256xf32> to vector<8x256xf32>
    %33 = arith.mulf %30, %32 : vector<8x256xf32>
    %c239_i32 = arith.constant 239 : i32
    %34 = tpu.dynamic_rotate %1 by %c239_i32 dim 1 : vector<8x256xf32>, i32 -> vector<8x256xf32>
    %c8 = arith.constant 8 : index
    %c0_11 = arith.constant 0 : index
    %35 = vector.load %arg2[%c8, %c0_11] : memref<9x256xf32, #tpu.memory_space<vmem>>, vector<1x256xf32>
    %36 = vector.broadcast %35 : vector<1x256xf32> to vector<8x256xf32>
    %37 = arith.mulf %34, %36 : vector<8x256xf32>
    %38 = tpu.concatenate %6, %10, %14, %18, %21, %25, %29, %33, %37 in 0 : vector<8x256xf32>, vector<8x256xf32>, vector<8x256xf32>, vector<8x256xf32>, vector<8x256xf32>, vector<8x256xf32>, vector<8x256xf32>, vector<8x256xf32>, vector<8x256xf32> -> vector<72x256xf32>
    %c0_12 = arith.constant 0 : index
    %c0_13 = arith.constant 0 : index
    %39 = vector.load %arg3[%c0_12, %c0_13] : memref<8x72xf32, #tpu.memory_space<vmem>>, vector<8x72xf32>
    %cst = arith.constant dense<0.000000e+00> : vector<8x256xf32>
    %40 = tpu.matmul %39, %38, %cst {dimension_numbers = #tpu.dot_dimension_numbers<[1], [0], [0], [1], [0, 0, 1, 1], [], []>} : vector<8x72xf32>, vector<72x256xf32>, vector<8x256xf32> -> vector<8x256xf32>
    %41 = vector.extract_strided_slice %40 {offsets = [0, 0], sizes = [4, 256], strides = [1, 1]} : vector<8x256xf32> to vector<4x256xf32>
    %c0_14 = arith.constant 0 : index
    %c0_15 = arith.constant 0 : index
    %42 = vector.load %arg5[%c0_14, %c0_15] : memref<4x1xf32, #tpu.memory_space<vmem>>, vector<4x1xf32>
    %43 = vector.broadcast %42 : vector<4x1xf32> to vector<4x256xf32>
    %44 = arith.addf %41, %43 : vector<4x256xf32>
    %45 = arith.negf %44 : vector<4x256xf32>
    %46 = math.exp %45 : vector<4x256xf32>
    %cst_16 = arith.constant 1.000000e+00 : f32
    %47 = vector.broadcast %cst_16 : f32 to vector<4x256xf32>
    %48 = arith.addf %47, %46 : vector<4x256xf32>
    %49 = arith.divf %47, %48 : vector<4x256xf32>
    %50 = vector.extract_strided_slice %40 {offsets = [4, 0], sizes = [4, 256], strides = [1, 1]} : vector<8x256xf32> to vector<4x256xf32>
    %51 = arith.mulf %49, %2 : vector<4x256xf32>
    %cst_17 = arith.constant 0.000000e+00 : f32
    %52 = vector.broadcast %cst_17 : f32 to vector<4x256xf32>
    %53 = tpu.concatenate %51, %52 in 0 : vector<4x256xf32>, vector<4x256xf32> -> vector<8x256xf32>
    %c17_i32_18 = arith.constant 17 : i32
    %54 = tpu.dynamic_rotate %53 by %c17_i32_18 dim 1 : vector<8x256xf32>, i32 -> vector<8x256xf32>
    %c0_19 = arith.constant 0 : index
    %c0_20 = arith.constant 0 : index
    %55 = vector.load %arg2[%c0_19, %c0_20] : memref<9x256xf32, #tpu.memory_space<vmem>>, vector<1x256xf32>
    %56 = vector.broadcast %55 : vector<1x256xf32> to vector<8x256xf32>
    %57 = arith.mulf %54, %56 : vector<8x256xf32>
    %c16_i32_21 = arith.constant 16 : i32
    %58 = tpu.dynamic_rotate %53 by %c16_i32_21 dim 1 : vector<8x256xf32>, i32 -> vector<8x256xf32>
    %c1_22 = arith.constant 1 : index
    %c0_23 = arith.constant 0 : index
    %59 = vector.load %arg2[%c1_22, %c0_23] : memref<9x256xf32, #tpu.memory_space<vmem>>, vector<1x256xf32>
    %60 = vector.broadcast %59 : vector<1x256xf32> to vector<8x256xf32>
    %61 = arith.mulf %58, %60 : vector<8x256xf32>
    %c15_i32_24 = arith.constant 15 : i32
    %62 = tpu.dynamic_rotate %53 by %c15_i32_24 dim 1 : vector<8x256xf32>, i32 -> vector<8x256xf32>
    %c2_25 = arith.constant 2 : index
    %c0_26 = arith.constant 0 : index
    %63 = vector.load %arg2[%c2_25, %c0_26] : memref<9x256xf32, #tpu.memory_space<vmem>>, vector<1x256xf32>
    %64 = vector.broadcast %63 : vector<1x256xf32> to vector<8x256xf32>
    %65 = arith.mulf %62, %64 : vector<8x256xf32>
    %c1_i32_27 = arith.constant 1 : i32
    %66 = tpu.dynamic_rotate %53 by %c1_i32_27 dim 1 : vector<8x256xf32>, i32 -> vector<8x256xf32>
    %c3_28 = arith.constant 3 : index
    %c0_29 = arith.constant 0 : index
    %67 = vector.load %arg2[%c3_28, %c0_29] : memref<9x256xf32, #tpu.memory_space<vmem>>, vector<1x256xf32>
    %68 = vector.broadcast %67 : vector<1x256xf32> to vector<8x256xf32>
    %69 = arith.mulf %66, %68 : vector<8x256xf32>
    %c4_30 = arith.constant 4 : index
    %c0_31 = arith.constant 0 : index
    %70 = vector.load %arg2[%c4_30, %c0_31] : memref<9x256xf32, #tpu.memory_space<vmem>>, vector<1x256xf32>
    %71 = vector.broadcast %70 : vector<1x256xf32> to vector<8x256xf32>
    %72 = arith.mulf %53, %71 : vector<8x256xf32>
    %c255_i32_32 = arith.constant 255 : i32
    %73 = tpu.dynamic_rotate %53 by %c255_i32_32 dim 1 : vector<8x256xf32>, i32 -> vector<8x256xf32>
    %c5_33 = arith.constant 5 : index
    %c0_34 = arith.constant 0 : index
    %74 = vector.load %arg2[%c5_33, %c0_34] : memref<9x256xf32, #tpu.memory_space<vmem>>, vector<1x256xf32>
    %75 = vector.broadcast %74 : vector<1x256xf32> to vector<8x256xf32>
    %76 = arith.mulf %73, %75 : vector<8x256xf32>
    %c241_i32_35 = arith.constant 241 : i32
    %77 = tpu.dynamic_rotate %53 by %c241_i32_35 dim 1 : vector<8x256xf32>, i32 -> vector<8x256xf32>
    %c6_36 = arith.constant 6 : index
    %c0_37 = arith.constant 0 : index
    %78 = vector.load %arg2[%c6_36, %c0_37] : memref<9x256xf32, #tpu.memory_space<vmem>>, vector<1x256xf32>
    %79 = vector.broadcast %78 : vector<1x256xf32> to vector<8x256xf32>
    %80 = arith.mulf %77, %79 : vector<8x256xf32>
    %c240_i32_38 = arith.constant 240 : i32
    %81 = tpu.dynamic_rotate %53 by %c240_i32_38 dim 1 : vector<8x256xf32>, i32 -> vector<8x256xf32>
    %c7_39 = arith.constant 7 : index
    %c0_40 = arith.constant 0 : index
    %82 = vector.load %arg2[%c7_39, %c0_40] : memref<9x256xf32, #tpu.memory_space<vmem>>, vector<1x256xf32>
    %83 = vector.broadcast %82 : vector<1x256xf32> to vector<8x256xf32>
    %84 = arith.mulf %81, %83 : vector<8x256xf32>
    %c239_i32_41 = arith.constant 239 : i32
    %85 = tpu.dynamic_rotate %53 by %c239_i32_41 dim 1 : vector<8x256xf32>, i32 -> vector<8x256xf32>
    %c8_42 = arith.constant 8 : index
    %c0_43 = arith.constant 0 : index
    %86 = vector.load %arg2[%c8_42, %c0_43] : memref<9x256xf32, #tpu.memory_space<vmem>>, vector<1x256xf32>
    %87 = vector.broadcast %86 : vector<1x256xf32> to vector<8x256xf32>
    %88 = arith.mulf %85, %87 : vector<8x256xf32>
    %89 = tpu.concatenate %57, %61, %65, %69, %72, %76, %80, %84, %88 in 0 : vector<8x256xf32>, vector<8x256xf32>, vector<8x256xf32>, vector<8x256xf32>, vector<8x256xf32>, vector<8x256xf32>, vector<8x256xf32>, vector<8x256xf32>, vector<8x256xf32> -> vector<72x256xf32>
    %c0_44 = arith.constant 0 : index
    %c0_45 = arith.constant 0 : index
    %90 = vector.load %arg4[%c0_44, %c0_45] : memref<4x72xf32, #tpu.memory_space<vmem>>, vector<4x72xf32>
    %cst_46 = arith.constant dense<0.000000e+00> : vector<4x256xf32>
    %91 = tpu.matmul %90, %89, %cst_46 {dimension_numbers = #tpu.dot_dimension_numbers<[1], [0], [0], [1], [0, 0, 1, 1], [], []>} : vector<4x72xf32>, vector<72x256xf32>, vector<4x256xf32> -> vector<4x256xf32>
    %92 = arith.addf %50, %91 : vector<4x256xf32>
    %c0_47 = arith.constant 0 : index
    %c0_48 = arith.constant 0 : index
    %93 = vector.load %arg6[%c0_47, %c0_48] : memref<4x1xf32, #tpu.memory_space<vmem>>, vector<4x1xf32>
    %94 = vector.broadcast %93 : vector<4x1xf32> to vector<4x256xf32>
    %95 = arith.addf %92, %94 : vector<4x256xf32>
    %96 = math.tanh %95 : vector<4x256xf32>
    %cst_49 = arith.constant 1.000000e+00 : f32
    %97 = vector.broadcast %cst_49 : f32 to vector<4x256xf32>
    %98 = arith.subf %97, %49 : vector<4x256xf32>
    %99 = arith.mulf %98, %96 : vector<4x256xf32>
    %100 = arith.addf %51, %99 : vector<4x256xf32>
    %c0_50 = arith.constant 0 : index
    %c0_51 = arith.constant 0 : index
    %c0_52 = arith.constant 0 : index
    %101 = vector.load %arg7[%c0_50, %c0_51, %c0_52] : memref<1x4x256xf32, #tpu.memory_space<vmem>>, vector<1x4x256xf32>
    %102 = vector.shape_cast %101 : vector<1x4x256xf32> to vector<4x256xf32>
    %103 = vector.shape_cast %100 : vector<4x256xf32> to vector<1x4x256xf32>
    tpu.vector_store %arg7[%c0_50, %c0_51, %c0_52], %103 {strides = array<i32>} : memref<1x4x256xf32, #tpu.memory_space<vmem>>, vector<1x4x256xf32>,
    return
  }
  func.func @transform_0(%arg0: i32) -> (i32, i32, i32) {
    %c0_i32 = arith.constant 0 : i32
    %c0_i32_0 = arith.constant 0 : i32
    %c0_i32_1 = arith.constant 0 : i32
    return %arg0, %c0_i32, %c0_i32_0 : i32, i32, i32
  }
  func.func @transform_1(%arg0: i32) -> (i32, i32) {
    %c0_i32 = arith.constant 0 : i32
    %c0_i32_0 = arith.constant 0 : i32
    %c0_i32_1 = arith.constant 0 : i32
    return %c0_i32, %c0_i32_0 : i32, i32
  }
  func.func @transform_2(%arg0: i32) -> (i32, i32) {
    %c0_i32 = arith.constant 0 : i32
    %c0_i32_0 = arith.constant 0 : i32
    %c0_i32_1 = arith.constant 0 : i32
    return %c0_i32, %c0_i32_0 : i32, i32
  }
  func.func @transform_3(%arg0: i32) -> (i32, i32) {
    %c0_i32 = arith.constant 0 : i32
    %c0_i32_0 = arith.constant 0 : i32
    %c0_i32_1 = arith.constant 0 : i32
    return %c0_i32, %c0_i32_0 : i32, i32
  }
  func.func @transform_4(%arg0: i32) -> (i32, i32) {
    %c0_i32 = arith.constant 0 : i32
    %c0_i32_0 = arith.constant 0 : i32
    %c0_i32_1 = arith.constant 0 : i32
    return %c0_i32, %c0_i32_0 : i32, i32
  }
  func.func @transform_5(%arg0: i32) -> (i32, i32) {
    %c0_i32 = arith.constant 0 : i32
    %c0_i32_0 = arith.constant 0 : i32
    %c0_i32_1 = arith.constant 0 : i32
    return %c0_i32, %c0_i32_0 : i32, i32
  }
  func.func @transform_6(%arg0: i32) -> (i32, i32, i32) {
    %c0_i32 = arith.constant 0 : i32
    %c0_i32_0 = arith.constant 0 : i32
    %c0_i32_1 = arith.constant 0 : i32
    return %arg0, %c0_i32, %c0_i32_0 : i32, i32, i32
  }
}

</mosaic_0001>

<bundles_post_ra>
// kernel: tpu_custom_call.1
= control target key start
LH: loop header
LB: loop body
LE: loop exit
PB: predicated region body
PF: predicated region fallthrough
CT: control target
= control target key end

     0   :  { %s1551_s0 = inlined_call_operand.hbm [shape: f32[2,8,256], index: 0, kind: input, shape index: {}]   ;;  %s1552_s1 = inlined_call_operand.hbm [shape: f32[9,256], index: 1, kind: input, shape index: {}]   ;;  %s1553_s2 = inlined_call_operand.vmem [shape: f32[8,72], index: 2, kind: input, shape index: {}]   ;;  %s1554_s3 = inlined_call_operand.vmem [shape: f32[4,72], index: 3, kind: input, shape index: {}]   ;;  %s1555_s4 = inlined_call_operand.vmem [shape: f32[4,1], index: 4, kind: input, shape index: {}]   ;;  %s1556_s5 = inlined_call_operand.vmem [shape: f32[4,1], index: 5, kind: input, shape index: {}]   ;;  %s1557_s6 = inlined_call_operand.hbm [shape: f32[2,4,256], index: 6, kind: output, shape index: {}]  }
   0x1   :  { %1562 = sst [smem:[#allocation11_spill]] %s1552_s1 }
   0x2   :  { %11 = vsyncpa [#allocation3], 0 }
   0x3   :  { %13 = vsyncpa [#allocation3 + $0x1], 0 }
   0x4   :  { %14 = vsyncpa [#allocation6], 0 }
   0x5   :  { %15 = vsyncpa [#allocation4], 0 }
   0x6   :  { %17 = vsyncpa [#allocation4 + $0x1], 0  ;;  %s1134_s21 = smov 0   ;;  %s1136_s22 = smov 0  }
   0x7   :  { %s1138_s23 = smov 0   ;;  %s1140_s24 = smov 0  }
   0x8 LB: > { %s1155_s25 = sadd.s32 4294967295, %s1082_s24   ;;  %s856_s26 = sadd.s32 4294967294, %s1082_s24   ;;  %s1082_s24 = sphi %s1140_s24, %s1581_s24   ;;  %s1078_s23 = sphi %s1138_s23, %s1580_s23   ;;  %s1074_s22 = sphi %s1136_s22, %s1579_s22   ;;  %s1070_s21 = sphi %s1134_s21, %s1578_s21  }
   0x9   : > { %p43_p0 = scmp.ne.s32.totalorder %s1074_s22, %s1070_s21  ;;  %p1558_p1 = scmp.eq.s32.totalorder %s1155_s25, 0 }
   0xa   : > { %p178_p3 = scmp.eq.s32.totalorder %s856_s26, 1  ;;  %p857_p5 = scmp.ge.s32.totalorder %s1082_s24, 1 }
   0xb   : > { %p1164_p4 = por %p1558_p1, %p43_p0  ;;  %p185_p7 = scmp.lt.s32.totalorder %s1082_s24, 3 }
   0xc   : > { %p1169_p6 = por %p178_p3, %p43_p0  ;;  %s1084_s30 = smov [#allocation5]  }
   0xd   : > { %s1563_s27 = scalar_select %p1164_p4, 1, 0 }
   0xe   : > { %s1564_s28 = scalar_select %p1169_p6, 1, 0 }
   0xf   : > { %p1174_p8 = pnand %p857_p5, %p185_p7  ;;  %s197_s7 = sshll.u32 %s1084_s30, 4  ;;  %s198_s7 = int_to_ptr.vmem [resolvable:$true] %s197_s7 }
  0x10   : > { %s1188_s9 = sadd.s32 1, %s1082_s24   ;;  %s30_s10 = sadd.s32 1, %s1078_s23 }
  0x11   : > { %s1565_s29 = scalar_select %p1174_p8, 1, 0 }
  0x12   : > { %p886_p9 = pneg %p1174_p8  ;;  %s27_s11 = ssub.s32 %s1082_s24, %s1188_s9 }
  0x13   : > { %s971_s12 = scalar_lea.vmem %s198_s7, 512  ;;  %p979_p5 = scmp.lt.s32.totalorder %s198_s7, %s198_s7 }
  0x14   : > { %p1183_p11 = pnand %p886_p9, %p1558_p1  ;;  %p972_p13 = scmp.ne.s32.totalorder %s198_s7, %s971_s12 }
  0x15   : > { %p980_p7 = scmp.lt.s32.totalorder %s971_s12, %s971_s12 }
  0x16   : > { %p962_p12 = pneg %p1183_p11 }
  0x17   : > { %p981_p10 = por %p980_p7, %p979_p5 }
  0x18   : > { %p974_p0 = pnand %p972_p13, %p962_p12 }
  0x1a   : > { %p975_p3 = pneg %p974_p0 }
  0x1c   : > { %p982_p2 = pnand %p981_p10, %p975_p3 }
  0x1e   : > { %985 = shalt.err (!%p982_p2)
}
  0x1f   : > { %s1085_s13 = smov 256   ;;  %s1086_s14 = smov 16  }
  0x20   : > { %s1567_s1 = sld [smem:[#allocation11_spill]]  ;;  %p28_p9 = scmp.eq.s32.totalorder %s27_s11, 0 }
  0x21   : > { %p37_p12 = scmp.ne.s32.totalorder %s1078_s23, %s1074_s22  ;;  %p38_p10 = scmp.eq.s32.totalorder %s1082_s24, 0 }
  0x22   : > { %p899_p2 = scmp.lt.s32.totalorder %s1082_s24, 2  ;;  %p1568_p0 = scmp.eq.s32.totalorder %s1155_s25, 1 }
  0x23   : > { %s1205_s17 = scalar_select %p28_p9, %s1078_s23, %s30_s10  }
  0x24   : > { %p39_p13 = por %p38_p10, %p37_p12  ;;  %p1209_p3 = por %p1568_p0, %p37_p12 }
  0x25   : > { %s223_s19 = sand.u32 1, %s1078_s23   ;;  %s876_s20 = sshll.u32 %s1082_s24, 8 }
  0x26   : > { %889 = dma.hbm_to_vmem [thread:$0]  (!%p1183_p11), %s1567_s1, 512, %s198_s7, [#allocation6], %s1085_s13, %s1085_s13, %s1086_s14  }
  0x27   : > { %s1569_s18 = scalar_select %p1209_p3, 1, 0 }
  0x28   : > { %s860_s26 = sshll.u32 %s223_s19, 4  ;;  %s1218_s12 = scalar_lea.hbm %s1551_s0, %s876_s20 }
  0x29   : > { %s227_s7 = scalar_lea.vmem [#allocation2], %s860_s26  ;;  %p1220_p11 = pnand %p899_p2, %p39_p13 }
  0x2a   : > { %s235_s10 = sshll.u32 %s227_s7, 4  ;;  %s224_s13 = scalar_lea.sflag [#allocation3], %s223_s19  ;;  %s236_s10 = int_to_ptr.vmem [resolvable:$true] %s235_s10 }
  0x2b   : > { %s986_s14 = scalar_lea.hbm %s1218_s12, 256  ;;  %p988_p7 = pneg %p1220_p11 }
  0x2c   : > { %p987_p5 = scmp.ne.s32.totalorder %s1218_s12, %s986_s14  ;;  %s991_s20 = scalar_lea.hbm %s1551_s0, 512 }
  0x2d   : > { %p992_p10 = scmp.lt.s32.totalorder %s1218_s12, %s1551_s0  ;;  %p993_p2 = scmp.lt.s32.totalorder %s991_s20, %s986_s14 }
  0x2e   : > { %p989_p9 = pnand %p988_p7, %p987_p5 }
  0x2f   : > { %p994_p13 = por %p993_p2, %p992_p10 }
  0x30   : > { %p990_p12 = pneg %p989_p9 }
  0x32   : > { %p995_p0 = pnand %p994_p13, %p990_p12 }
  0x34   : > { %998 = shalt.err (!%p995_p0)
}
  0x35   : > { %s999_s8 = scalar_lea.vmem %s236_s10, 256  ;;  %s1087_s19 = smov [#allocation2]  }
  0x36   : > { %p1000_p1 = scmp.ne.s32.totalorder %s236_s10, %s999_s8  ;;  %s1004_s7 = sshll.u32 %s1087_s19, 4  ;;  %s1005_s7 = int_to_ptr.vmem [resolvable:$false] %s1004_s7 }
  0x37   : > { %s1006_s1 = scalar_lea.vmem %s1005_s7, 512  ;;  %p1007_p5 = scmp.lt.s32.totalorder %s236_s10, %s1005_s7 }
  0x38   : > { %p1002_p6 = pnand %p1000_p1, %p988_p7  ;;  %p1008_p9 = scmp.lt.s32.totalorder %s1006_s1, %s999_s8 }
  0x3a   : > { %p1003_p3 = pneg %p1002_p6  ;;  %p1009_p4 = por %p1008_p9, %p1007_p5 }
  0x3c   : > { %p1010_p8 = pnand %p1009_p4, %p1003_p3 }
  0x3e   : > { %1013 = shalt.err (!%p1010_p8)
}
  0x3f   : > { %893 = dma.hbm_to_vmem [thread:$0]  (!%p1220_p11), %s1218_s12, 256, %s236_s10, %s224_s13  }
  0x40   : > { %p1571_p12 = scmp.ne.s32.totalorder %s1565_s29, 0 }
  0x41   : > { %s1241_s14 = sand.u32 (!%p1571_p12), 1, %s1074_s22   ;;  %p1572_p1 = scmp.ne.s32.totalorder (!%p1571_p12), %s1563_s27, 0 }
  0x42   : > { %244 = sbr.rel (%p1571_p12) target bundleno = 842 (0x34a), region = 44  ;;  %s864_s15 = sshll.u32 (!%p1571_p12), %s1241_s14, 4 }
  0x43   : > { %s247_s16 = scalar_lea.sflag (!%p1571_p12), [#allocation3], %s1241_s14  ;;  %s250_s20 = scalar_lea.vmem (!%p1571_p12), [#allocation2], %s864_s15 }
  0x47   : > { %1057 = dma.done.wait (%p1572_p1), %s247_s16, 256  }
  0x48   : > { %1059 = vsyncadd (%p1572_p1), %s247_s16, 4294967040  ;;  %p1573_p4 = scmp.eq.s32.totalorder %s1155_s25, 0 }
  0x4a   : > { %1061 = dma.done.wait (%p1573_p4), [#allocation6], 512   ;;  %p1574_p6 = pmov %p1573_p4 }
  0x4b   : > { %v1253_v0 = vld [vmem:[%s250_s20] sm:$0xff]  ;;  %s1088_s1 = smov 112   ;;  %s1089_s29 = smov 111   ;;  %v1259_v1 = vld [vmem:[%s250_s20 + $0x8] sm:$0xff]  ;;  %v1093_v2 = vmov 0.0   ;;  %v1095_v3 = vmov 0   ;;  %v289_v5 = vlaneseq }
  0x4c   : > { %1063 = vsyncadd (%p1574_p6), [#allocation6], 4294966784  ;;  %433 = vrot.lane.b32.xlu1 %v1253_v0, %s1088_s1  ;;  %455 = vrot.lane.b32.xlu0 %v1253_v0, %s1089_s29  ;;  %s1090_s27 = smov 113   ;;  %s1091_s12 = smov 127   ;;  %v553_v4 = vld [vmem:[%s1555_s4] sm:$0xf] }
  0x4d   : > { %s1092_s10 = smov 1   ;;  %546 = vmatprep.mubr.f32.mxu0 %v1093_v2  ;;  %718 = vmatprep.mubr.f32.mxu1 %v1093_v2  ;;  %s1094_s11 = smov 15   ;;  %v297_v6 = vshrl.u32 %v289_v5, 7  ;;  %v1292_v7 = vand.u32 127, %v289_v5  ;;  %vm478_vm8 = vcmask 588800   ;;  %vm581_vm9 = vcmask 1043456  }
  0x4e   : > { %947 = vset.pattern.permute.xlu0 %v1095_v3  ;;  %s1096_s13 = smov 16   ;;  %s1097_s30 = smov 17   ;;  %v463_v10 = vld [vmem:[#allocation5 + $0x10] ss:$8 sm:$0x3] }
  0x4f   : > { %v1294_v8 = vsub.s32 0, %v297_v6  ;;  %v1296_v9 = vsub.s32 1, %v297_v6  ;;  %v441_v13 = vld [vmem:[#allocation5 + $0x7] ss:$8 sm:$0x3]  ;;  %vm437_vm0 = vcmp.lt.s32.totalorder %v1292_v7, 112 }
  0x50   : > { %435 = vrot.lane.b32.xlu1 %v1259_v1, %s1088_s1  ;;  %457 = vrot.lane.b32.xlu0 %v1259_v1, %s1089_s29  ;;  %vm459_vm1 = vcmp.lt.s32.totalorder %v1292_v7, 111  ;;  %v419_v15 = vld [vmem:[#allocation5 + $0x6] ss:$8 sm:$0x3]  ;;  %vm415_vm2 = vcmp.lt.s32.totalorder %v1292_v7, 113  ;;  %vm393_vm3 = vcmp.lt.s32.totalorder %v1292_v7, 127 }
  0x51   : > { %v1301_v14 = vrot.slane %v463_v10, %v1296_v9  ;;  %v1304_v16 = vrot.slane %v463_v10, %v1294_v8  ;;  %v1307_v17 = vrot.slane %v441_v13, %v1294_v8  ;;  %v1310_v18 = vrot.slane %v441_v13, %v1296_v9  ;;  %v397_v29 = vld [vmem:[#allocation5 + $0x5] ss:$8 sm:$0x3]  ;;  %v375_v30 = vld [vmem:[#allocation5 + $0x4] ss:$8 sm:$0x3] }
  0x52   : > { %v1320_v24 = vrot.slane %v419_v15, %v1294_v8  ;;  %v1326_v27 = vrot.slane %v419_v15, %v1296_v9  ;;  %v1337_v37 = vrot.slane %v397_v29, %v1294_v8  ;;  %v1342_v40 = vrot.slane %v397_v29, %v1296_v9  ;;  %v360_v41 = vld [vmem:[#allocation5 + $0x3] ss:$8 sm:$0x3]  ;;  %v338_v54 = vld [vmem:[#allocation5 + $0x2] ss:$8 sm:$0x3] }
  0x53   : > { %v1345_v42 = vrot.slane %v375_v30, %v1296_v9  ;;  %v1348_v43 = vrot.slane %v375_v30, %v1294_v8  ;;  %vm356_vm4 = vcmp.lt.s32.totalorder %v1292_v7, 1  ;;  %v1356_v48 = vrot.slane %v360_v41, %v1294_v8  ;;  %v316_v63 = vld [vmem:[#allocation5 + $0x1] ss:$8 sm:$0x3]  ;;  %s762_s26 = scalar_lea.sflag [#allocation4], %s1241_s14  ;;  %p1575_p3 = scmp.ne.s32.totalorder %s1569_s18, 0 }
  0x54   : > { %413 = vrot.lane.b32.xlu1 %v1259_v1, %s1090_s27  ;;  %411 = vrot.lane.b32.xlu0 %v1253_v0, %s1090_s27  ;;  %v1361_v51 = vrot.slane %v360_v41, %v1296_v9  ;;  %vm334_vm5 = vcmp.lt.s32.totalorder %v1292_v7, 15  ;;  %v1375_v61 = vrot.slane %v338_v54, %v1294_v8  ;;  %v1378_v62 = vrot.slane %v338_v54, %v1296_v9  ;;  %v294_v13 = vld [vmem:[#allocation5] ss:$8 sm:$0x3] }
  0x55   : > { %v388_v52 = vmul.f32 %v1345_v42, %v1259_v1  ;;  %v387_v53 = vmul.f32 %v1348_v43, %v1253_v0  ;;  %vm312_vm6 = vcmp.lt.s32.totalorder %v1292_v7, 16  ;;  %vm291_vm7 = vcmp.lt.s32.totalorder %v1292_v7, 17 }
  0x58   : > { %391 = vrot.lane.b32.xlu1 %v1259_v1, %s1091_s12  ;;  %389 = vrot.lane.b32.xlu0 %v1253_v0, %s1091_s12 }
  0x5c   : > { %354 = vrot.lane.b32.xlu1 %v1259_v1, %s1092_s10  ;;  %352 = vrot.lane.b32.xlu0 %v1253_v0, %s1092_s10 }
  0x60   : > { %332 = vrot.lane.b32.xlu1 %v1259_v1, %s1094_s11  ;;  %330 = vrot.lane.b32.xlu0 %v1253_v0, %s1094_s11 }
  0x64   : > { %310 = vrot.lane.b32.xlu1 %v1259_v1, %s1096_s13  ;;  %308 = vrot.lane.b32.xlu0 %v1253_v0, %s1096_s13 }
  0x68   : > { %287 = vrot.lane.b32.xlu1 %v1259_v1, %s1097_s30  ;;  %285 = vrot.lane.b32.xlu0 %v1253_v0, %s1097_s30 }
  0x6c   : > { %556 = vperm.xlu0 %947, %v553_v4  }
  0xbe   : > { %v434_v11 = vpop.permute.xlu1 %433  ;;  %v456_v12 = vpop.permute.xlu0 %455 }
  0xc2   : > { %v436_v19 = vpop.permute.xlu1 %435  ;;  %v458_v20 = vpop.permute.xlu0 %457 }
  0xc3   : > { %v439_v21 = vsel %vm437_vm0, %v436_v19, %v434_v11  ;;  %v460_v22 = vsel %vm459_vm1, %v456_v12, %v458_v20  ;;  %v461_v23 = vsel %vm459_vm1, %v458_v20, %v456_v12  ;;  %v438_v25 = vsel %vm437_vm0, %v434_v11, %v436_v19 }
  0xc4   : > { %v476_v26 = vmul.f32 %v1301_v14, %v461_v23  ;;  %v475_v28 = vmul.f32 %v1304_v16, %v460_v22  ;;  %v454_v31 = vmul.f32 %v1310_v18, %v439_v21  ;;  %v453_v34 = vmul.f32 %v1307_v17, %v438_v25 }
  0xc5   : > { %v1388_v11 = vrot.slane %v316_v63, %v1294_v8  ;;  %v1391_v12 = vrot.slane %v316_v63, %v1296_v9  ;;  %v1401_v25 = vrot.slane %v294_v13, %v1294_v8  ;;  %v477_v8 = vld [vmem:[%s1553_s2] sm:$0xff] }
  0xc6   : > { %v414_v32 = vpop.permute.xlu1 %413  ;;  %496 = vmatprep.subr.mxu0 %v476_v26  ;;  %v412_v33 = vpop.permute.xlu0 %411  ;;  %v1404_v26 = vrot.slane %v294_v13, %v1296_v9 }
  0xc7   : > { %v416_v35 = vsel %vm415_vm2, %v412_v33, %v414_v32  ;;  %v417_v36 = vsel %vm415_vm2, %v414_v32, %v412_v33  ;;  %497 = vmatpush1.msra.mxu0 %v475_v28 }
  0xc8   : > { %v431_v38 = vmul.f32 %v1320_v24, %v416_v35  ;;  %v432_v39 = vmul.f32 %v1326_v27, %v417_v36  ;;  %498 = vmatprep.subr.mxu0 %v454_v31 }
  0xc9   : > { %499 = vmatpush1.msra.mxu0 %v453_v34 }
  0xca   : > { %v392_v44 = vpop.permute.xlu1 %391  ;;  %500 = vmatprep.subr.mxu0 %v432_v39  ;;  %v390_v45 = vpop.permute.xlu0 %389 }
  0xcb   : > { %v394_v46 = vsel %vm393_vm3, %v390_v45, %v392_v44  ;;  %v395_v47 = vsel %vm393_vm3, %v392_v44, %v390_v45  ;;  %501 = vmatpush1.msra.mxu0 %v431_v38 }
  0xcc   : > { %v409_v49 = vmul.f32 %v1337_v37, %v394_v46  ;;  %v410_v50 = vmul.f32 %v1342_v40, %v395_v47 }
  0xce   : > { %v355_v55 = vpop.permute.xlu1 %354  ;;  %502 = vmatprep.subr.mxu0 %v410_v50  ;;  %v353_v56 = vpop.permute.xlu0 %352  ;;  %v576_v50 = vrot.slane %v1259_v1, 4  ;;  %v733_v1 = vld [vmem:[%s1556_s5] sm:$0xf] }
  0xcf   : > { %v357_v57 = vsel %vm356_vm4, %v353_v56, %v355_v55  ;;  %v358_v58 = vsel %vm356_vm4, %v355_v55, %v353_v56  ;;  %503 = vmatpush1.msra.mxu0 %v409_v49  ;;  %v575_v49 = vrot.slane %v1253_v0, 4 }
  0xd0   : > { %v372_v59 = vmul.f32 %v1356_v48, %v358_v58  ;;  %v373_v60 = vmul.f32 %v1361_v51, %v357_v57  ;;  %504 = vmatprep.subr.mxu0 %v388_v52 }
  0xd1   : > { %505 = vmatpush1.msra.mxu0 %v387_v53 }
  0xd2   : > { %v333_v2 = vpop.permute.xlu1 %332  ;;  %v331_v3 = vpop.permute.xlu0 %330  ;;  %506 = vmatprep.subr.mxu0 %v373_v60 }
  0xd3   : > { %v335_v4 = vsel %vm334_vm5, %v331_v3, %v333_v2  ;;  %v336_v5 = vsel %vm334_vm5, %v333_v2, %v331_v3  ;;  %507 = vmatpush1.msra.mxu0 %v372_v59 }
  0xd4   : > { %v350_v6 = vmul.f32 %v1375_v61, %v336_v5  ;;  %v351_v10 = vmul.f32 %v1378_v62, %v335_v4 }
  0xd6   : > { %v311_v15 = vpop.permute.xlu1 %310  ;;  %v309_v19 = vpop.permute.xlu0 %308  ;;  %508 = vmatprep.subr.mxu0 %v351_v10 }
  0xd7   : > { %v313_v20 = vsel %vm312_vm6, %v309_v19, %v311_v15  ;;  %v314_v21 = vsel %vm312_vm6, %v311_v15, %v309_v19  ;;  %509 = vmatpush1.msra.mxu0 %v350_v6 }
  0xd8   : > { %v328_v22 = vmul.f32 %v1388_v11, %v314_v21  ;;  %v329_v23 = vmul.f32 %v1391_v12, %v313_v20 }
  0xda   : > { %v288_v28 = vpop.permute.xlu1 %287  ;;  %v286_v29 = vpop.permute.xlu0 %285  ;;  %510 = vmatprep.subr.mxu0 %v329_v23 }
  0xdb   : > { %v292_v30 = vsel %vm291_vm7, %v286_v29, %v288_v28  ;;  %v293_v31 = vsel %vm291_vm7, %v288_v28, %v286_v29  ;;  %511 = vmatpush1.msra.mxu0 %v328_v22 }
  0xdc   : > { %v306_v32 = vmul.f32 %v1401_v25, %v293_v31  ;;  %v307_v33 = vmul.f32 %v1404_v26, %v292_v30 }
  0xde   : > { %512 = vmatprep.subr.mxu0 %v307_v33 }
  0xdf   : > { %513 = vmatpush1.msra.mxu0 %v306_v32 }
  0xe0   : > { %867 = vmatmul.mubr.msk.f32.vlgmr.msra.gmra.mxu0 %vm478_vm8, %v477_v8 }
  0xe7   : > { %v557_v9 = vpop.permute.xlu0 %556 }
 0x1a0   : > { %v1416_v34 = vpop.f32.mrf.mxu0 }
 0x1a1   : > { %v559_v35 = vadd.f32 %v557_v9, %v1416_v34 }
 0x1a2   : > { %v1419_v36 = vpop.f32.mrf.mxu0 }
 0x1a3   : > { %v868_v38 = vmul.f32 -1.442695, %v559_v35  ;;  %v560_v39 = vadd.f32 %v557_v9, %v1419_v36 }
 0x1a5   : > { %948 = vpow2.f32 %v868_v38  ;;  %v869_v41 = vmul.f32 -1.442695, %v560_v39 }
 0x1a7   : > { %950 = vpow2.f32 %v869_v41 }
 0x1b2   : > { %v949_v44 = vpop.eup %948 }
 0x1b3   : > { %v567_v45 = vadd.f32 1.0, %v949_v44 }
 0x1b4   : > { %v951_v46 = vpop.eup %950 }
 0x1b5   : > { %952 = vrcp.f32 %v567_v45  ;;  %v568_v47 = vadd.f32 1.0, %v951_v46 }
 0x1b7   : > { %954 = vrcp.f32 %v568_v47 }
 0x1c2   : > { %v1424_v52 = vpop.eup %952 }
 0x1c3   : > { %v1427_v53 = vmul.f32 %v1424_v52, %v575_v49 }
 0x1c4   : > { %v1429_v54 = vpop.eup %954 }
 0x1c5   : > { %v1432_v55 = vmul.f32 %v1429_v54, %v576_v50  ;;  %v582_v56 = vsel %vm581_vm9, %v1427_v53, 0.0 }
 0x1c6   : > { %634 = vrot.lane.b32.xlu0 %v582_v56, %s1088_s1  ;;  %642 = vrot.lane.b32.xlu1 %v582_v56, %s1089_s29  ;;  %v616_v8 = vmul.f32 %v582_v56, %v1348_v43 }
 0x1c7   : > { %v583_v0 = vsel %vm581_vm9, %v1432_v55, 0.0 }
 0x1ca   : > { %626 = vrot.lane.b32.xlu0 %v582_v56, %s1090_s27  ;;  %644 = vrot.lane.b32.xlu1 %v583_v0, %s1089_s29  ;;  %s866_s29 = sshll.u32 %s1241_s14, 3 }
 0x1ce   : > { %618 = vrot.lane.b32.xlu0 %v582_v56, %s1091_s12  ;;  %636 = vrot.lane.b32.xlu1 %v583_v0, %s1088_s1 }
 0x1d2   : > { %608 = vrot.lane.b32.xlu0 %v582_v56, %s1092_s10  ;;  %628 = vrot.lane.b32.xlu1 %v583_v0, %s1090_s27  ;;  %s877_s27 = sshll.u32 %s1155_s25, 7  ;;  %s1098_s25 = smov [#allocation7]  }
 0x1d3   : > { %s1018_s19 = sshll.u32 %s1098_s25, 4  ;;  %s1019_s19 = int_to_ptr.vmem [resolvable:$false] %s1018_s19 }
 0x1d4   : > { %s1020_s7 = scalar_lea.vmem %s1019_s19, 256 }
 0x1d6   : > { %600 = vrot.lane.b32.xlu0 %v582_v56, %s1094_s11  ;;  %620 = vrot.lane.b32.xlu1 %v583_v0, %s1091_s12  ;;  %s282_s12 = scalar_lea.vmem [#allocation7], %s866_s29 }
 0x1da   : > { %592 = vrot.lane.b32.xlu0 %v582_v56, %s1096_s13  ;;  %610 = vrot.lane.b32.xlu1 %v583_v0, %s1092_s10  ;;  %s776_s10 = sshll.u32 %s282_s12, 4  ;;  %s777_s10 = int_to_ptr.vmem [resolvable:$true] %s776_s10 }
 0x1db   : > { %s1014_s8 = scalar_lea.vmem %s777_s10, 128  ;;  %p1021_p10 = scmp.lt.s32.totalorder %s777_s10, %s1019_s19 }
 0x1dc   : > { %p1015_p8 = scmp.ne.s32.totalorder %s777_s10, %s1014_s8  ;;  %p1022_p2 = scmp.lt.s32.totalorder %s1020_s7, %s1014_s8 }
 0x1de   : > { %584 = vrot.lane.b32.xlu0 %v582_v56, %s1097_s30  ;;  %602 = vrot.lane.b32.xlu1 %v583_v0, %s1094_s11  ;;  %p1016_p11 = pnand %p1015_p8, %p1575_p3  ;;  %p1023_p13 = por %p1022_p2, %p1021_p10 }
 0x1e0   : > { %p1017_p7 = pneg %p1016_p11 }
 0x1e2   : > { %736 = vperm.xlu0 %947, %v733_v1   ;;  %594 = vrot.lane.b32.xlu1 %v583_v0, %s1096_s13  ;;  %p1024_p0 = pnand %p1023_p13, %p1017_p7 }
 0x1e6   : > { %586 = vrot.lane.b32.xlu1 %v583_v0, %s1097_s30  ;;  %s774_s30 = scalar_lea.hbm %s1557_s6, %s877_s27 }
 0x238   : > { %v635_v57 = vpop.permute.xlu0 %634  ;;  %v643_v58 = vpop.permute.xlu1 %642 }
 0x23c   : > { %v627_v59 = vpop.permute.xlu0 %626  ;;  %v645_v60 = vpop.permute.xlu1 %644 }
 0x23d   : > { %v646_v63 = vsel %vm459_vm1, %v643_v58, %v645_v60  ;;  %v647_v2 = vsel %vm459_vm1, %v645_v60, %v643_v58 }
 0x23e   : > { %v649_v3 = vmul.f32 %v647_v2, %v1301_v14  ;;  %v648_v4 = vmul.f32 %v646_v63, %v1304_v16  ;;  %v744_v63 = vsub.f32 1.0, %v1424_v52 }
 0x240   : > { %v619_v5 = vpop.permute.xlu0 %618  ;;  %668 = vmatprep.subr.mxu1 %v649_v3  ;;  %v637_v6 = vpop.permute.xlu1 %636 }
 0x241   : > { %v638_v10 = vsel %vm437_vm0, %v635_v57, %v637_v6  ;;  %v639_v13 = vsel %vm437_vm0, %v637_v6, %v635_v57  ;;  %669 = vmatpush1.msra.mxu1 %v648_v4 }
 0x242   : > { %v640_v15 = vmul.f32 %v638_v10, %v1307_v17  ;;  %v641_v19 = vmul.f32 %v639_v13, %v1310_v18 }
 0x244   : > { %670 = vmatprep.subr.mxu1 %v641_v19  ;;  %v629_v20 = vpop.permute.xlu1 %628  ;;  %v609_v21 = vpop.permute.xlu0 %608 }
 0x245   : > { %v630_v14 = vsel %vm415_vm2, %v627_v59, %v629_v20  ;;  %v631_v16 = vsel %vm415_vm2, %v629_v20, %v627_v59  ;;  %671 = vmatpush1.msra.mxu1 %v640_v15 }
 0x246   : > { %v632_v22 = vmul.f32 %v630_v14, %v1320_v24  ;;  %v633_v23 = vmul.f32 %v631_v16, %v1326_v27  ;;  %v617_v24 = vmul.f32 %v583_v0, %v1345_v42 }
 0x248   : > { %672 = vmatprep.subr.mxu1 %v633_v23  ;;  %v621_v28 = vpop.permute.xlu1 %620  ;;  %v601_v31 = vpop.permute.xlu0 %600 }
 0x249   : > { %v622_v17 = vsel %vm393_vm3, %v619_v5, %v621_v28  ;;  %v623_v18 = vsel %vm393_vm3, %v621_v28, %v619_v5  ;;  %673 = vmatpush1.msra.mxu1 %v632_v22  ;;  %v745_v5 = vsub.f32 1.0, %v1429_v54 }
 0x24a   : > { %v624_v29 = vmul.f32 %v622_v17, %v1337_v37  ;;  %v625_v30 = vmul.f32 %v623_v18, %v1342_v40 }
 0x24c   : > { %674 = vmatprep.subr.mxu1 %v625_v30  ;;  %v611_v32 = vpop.permute.xlu1 %610  ;;  %v593_v38 = vpop.permute.xlu0 %592 }
 0x24d   : > { %v612_v27 = vsel %vm356_vm4, %v609_v21, %v611_v32  ;;  %v613_v33 = vsel %vm356_vm4, %v611_v32, %v609_v21  ;;  %675 = vmatpush1.msra.mxu1 %v624_v29 }
 0x24e   : > { %v614_v9 = vmul.f32 %v613_v33, %v1356_v48  ;;  %v615_v37 = vmul.f32 %v612_v27, %v1361_v51  ;;  %676 = vmatprep.subr.mxu1 %v617_v24 }
 0x24f   : > { %677 = vmatpush1.msra.mxu1 %v616_v8 }
 0x250   : > { %v603_v40 = vpop.permute.xlu1 %602  ;;  %678 = vmatprep.subr.mxu1 %v615_v37  ;;  %v585_v46 = vpop.permute.xlu0 %584 }
 0x251   : > { %v604_v42 = vsel %vm334_vm5, %v601_v31, %v603_v40  ;;  %v605_v35 = vsel %vm334_vm5, %v603_v40, %v601_v31  ;;  %679 = vmatpush1.msra.mxu1 %v614_v9 }
 0x252   : > { %v606_v39 = vmul.f32 %v605_v35, %v1375_v61  ;;  %v607_v43 = vmul.f32 %v604_v42, %v1378_v62 }
 0x254   : > { %v595_v41 = vpop.permute.xlu1 %594  ;;  %680 = vmatprep.subr.mxu1 %v607_v43 }
 0x255   : > { %v596_v48 = vsel %vm312_vm6, %v593_v38, %v595_v41  ;;  %v597_v51 = vsel %vm312_vm6, %v595_v41, %v593_v38  ;;  %681 = vmatpush1.msra.mxu1 %v606_v39 }
 0x256   : > { %v598_v44 = vmul.f32 %v597_v51, %v1388_v11  ;;  %v599_v45 = vmul.f32 %v596_v48, %v1391_v12  ;;  %v650_v11 = vld [vmem:[%s1554_s3] sm:$0xf] }
 0x258   : > { %v587_v47 = vpop.permute.xlu1 %586  ;;  %682 = vmatprep.subr.mxu1 %v599_v45 }
 0x259   : > { %v588_v61 = vsel %vm291_vm7, %v585_v46, %v587_v47  ;;  %v589_v62 = vsel %vm291_vm7, %v587_v47, %v585_v46  ;;  %683 = vmatpush1.msra.mxu1 %v598_v44 }
 0x25a   : > { %v590_v49 = vmul.f32 %v589_v62, %v1401_v25  ;;  %v591_v50 = vmul.f32 %v588_v61, %v1404_v26 }
 0x25c   : > { %684 = vmatprep.subr.mxu1 %v591_v50 }
 0x25d   : > { %685 = vmatpush1.msra.mxu1 %v590_v49  ;;  %v737_v12 = vpop.permute.xlu0 %736 }
 0x25e   : > { %870 = vmatmul.mubr.msk.f32.vlgmr.msra.gmra.mxu1 %vm478_vm8, %v650_v11  ;;  %v738_v7 = vrot.slane %v737_v12, 4 }
 0x31e   : > { %v720_v56 = vpop.f32.mrf.mxu1 }
 0x31f   : > { %v727_v0 = vrot.slane %v720_v56, 4 }
 0x320   : > { %v722_v1 = vpop.f32.mrf.mxu1 }
 0x321   : > { %v731_v57 = vadd.f32 %v727_v0, %v1416_v34  ;;  %v728_v25 = vrot.slane %v722_v1, 4 }
 0x323   : > { %v740_v58 = vadd.f32 %v738_v7, %v731_v57  ;;  %v732_v26 = vadd.f32 %v728_v25, %v1419_v36 }
 0x325   : > { %956 = vtanh.f32 %v740_v58  ;;  %v741_v59 = vadd.f32 %v738_v7, %v732_v26 }
 0x327   : > { %958 = vtanh.f32 %v741_v59 }
 0x332   : > { %v957_v60 = vpop.eup %956 }
 0x333   : > { %v748_v2 = vrot.slane %v957_v60, 4 }
 0x334   : > { %v959_v3 = vpop.eup %958 }
 0x335   : > { %v752_v4 = vmul.f32 %v748_v2, %v744_v63  ;;  %v749_v34 = vrot.slane %v959_v3, 4 }
 0x337   : > { %v753_v6 = vmul.f32 %v749_v34, %v745_v5  ;;  %v754_v10 = vadd.f32 %v752_v4, %v1427_v53 }
 0x339   : > { %v755_v36 = vadd.f32 %v753_v6, %v1432_v55 }
 0x33b   : > { %v758_v13 = vcombine.low %v754_v10, %v755_v36 }
 0x33d   : > { %760 = vst [vmem:[%s282_s12] sm:$0xff] %v758_v13 }
 0x33e   : > { %1027 = shalt.err (!%p1024_p0)
}
 0x33f   : > { %s1028_s15 = scalar_lea.hbm %s774_s30, 128  ;;  %s1032_s20 = scalar_lea.hbm %s1557_s6, 256 }
 0x340   : > { %p1029_p5 = scmp.ne.s32.totalorder %s774_s30, %s1028_s15  ;;  %p1033_p1 = scmp.lt.s32.totalorder %s774_s30, %s1557_s6 }
 0x341   : > { %p1034_p4 = scmp.lt.s32.totalorder %s1032_s20, %s1028_s15 }
 0x342   : > { %p1030_p9 = pnand %p1029_p5, %p1575_p3 }
 0x343   : > { %p1035_p6 = por %p1034_p4, %p1033_p1 }
 0x344   : > { %p1031_p12 = pneg %p1030_p9 }
 0x346   : > { %p1036_p8 = pnand %p1035_p6, %p1031_p12 }
 0x348   : > { %1039 = shalt.err (!%p1036_p8)
}
 0x349   : > { %884 = dma.vmem_to_hbm [thread:$0]  (%p1575_p3), %s777_s10, 128, %s774_s30, %s762_s26  }
 0x34a PF: > { %s788_s27 = sand.u32 1, %s1070_s21   ;;  %p1576_p11 = scmp.ne.s32.totalorder %s1564_s28, 0 }
 0x34b   : > { %p1577_p7 = scmp.ge.s32.totalorder %s1082_s24, 2  ;;  %s789_s12 = scalar_lea.sflag [#allocation4], %s788_s27 }
 0x34d   : > { %p895_p10 = pnand %p1577_p7, %p1576_p11 }
 0x34f   : > { %p896_p2 = pneg %p895_p10 }
 0x351   : > { %1065 = dma.done.wait (%p896_p2), %s789_s12, 128  }
 0x352   : > { %1067 = vsyncadd (%p896_p2), %s789_s12, 4294967168  ;;  %p20_p13 = scmp.ge.s32.totalorder %s1188_s9, 4   ;;  %s1578_s21 = smov %s1074_s22 }
 0x353   : > { %s1579_s22 = smov %s1078_s23  ;;  %s1580_s23 = smov %s1205_s17 }
 0x354   : > { %s1581_s24 = smov %s1188_s9  ;;  %22 = sbr.rel (!%p20_p13) target bundleno = 8 (0x8), region = 101 }
 0x359   :  { %794 = vsyncpa [#allocation3], 1 }
 0x35a   :  { %796 = vsyncpa [#allocation3 + $0x1], 1 }
 0x35b   :  { %797 = vsyncpa [#allocation6], 1 }
 0x35c   :  { %798 = vsyncpa [#allocation4], 1 }
 0x35d   :  { %800 = vsyncpa [#allocation4 + $0x1], 1 }

</bundles_post_ra>
